<compile_context>
chip_gen: v5e
topology: v5e:2x2
jax: 0.10.0
libtpu: 0.0.40
codegen_flags: <defaults>
</compile_context>

<pallas_src>
import jax
import jax.numpy as jnp
import numpy as np
from jax.experimental import pallas as pl
from jax.experimental.pallas import tpu as pltpu

C_IN = 128        # conv_out input channels (fixed by the model)
N_BINS = 100      # conv_out output channels == number of depth bins
N_BINS_PAD = 128  # bins padded to a full sublane/lane multiple


def _round_up(x, m):
    return (x + m - 1) // m * m


def _head_kernel(x_ref, wt_ref, b_ref, c_ref, out_ref):
    """Fused 1x1 conv (matmul) + channel softmax + bin-center weighted sum.

    Pixels live on lanes, channels/bins on sublanes throughout, so no
    relayout/transpose is ever needed and the output store is lane-dense.

    x_ref:   (1, C_IN, TP)       NCHW-native pixel tile
    wt_ref:  (N_BINS_PAD, C_IN)  conv_out weight, padded bins are zero rows
    b_ref:   (N_BINS_PAD, 1)     conv_out bias, padded bins = -1e30 (exp -> 0)
    c_ref:   (1, N_BINS_PAD, 1)  per-batch bin centers, padded bins = 0
    out_ref: (1, 1, TP)          per-pixel predicted depth
    """
    x = x_ref[0]                                                # (C_IN, TP)
    # (NB, C) @ (C, TP) -> (NB, TP), f32 accumulation on the MXU.
    logits = jnp.dot(wt_ref[...], x, preferred_element_type=jnp.float32)
    logits = logits + b_ref[...]                                # (NB, TP)
    m = jnp.max(logits, axis=0, keepdims=True)                  # (1, TP)
    e = jnp.exp(logits - m)                                     # (NB, TP)
    s = jnp.sum(e, axis=0, keepdims=True)                       # (1, TP)
    num = jnp.sum(e * c_ref[0], axis=0, keepdims=True)          # (1, TP)
    depth = num / s                                             # (1, TP), exact
    out_ref[...] = depth.reshape(1, 1, -1)


def conv_softmax_bincenter(x_ncp, w, b, centers, *, tile_p=512,
                           compute_dtype=jnp.float32):
    """pred[n, p] = sum_o softmax_o(w[o, :] @ x[n, :, p] + b[o]) * centers[n, o].

    x_ncp:   (N, C_IN, P)    NCHW-native, spatially flattened (no transpose)
    w:       (N_BINS, C_IN)  1x1 conv weight (PyTorch layout, squeezed)
    b:       (N_BINS,)       conv bias
    centers: (N, N_BINS)     per-batch bin centers
    """
    N, C, P = x_ncp.shape
    assert C == C_IN and w.shape == (N_BINS, C_IN) and b.shape == (N_BINS,)

    # Pad the bin axis 100 -> 128: zero weight rows, -1e30 bias (exp underflows
    # to exactly 0), zero centers -> numerically identical, unmasked vregs.
    wt_pad = jnp.zeros((N_BINS_PAD, C_IN), jnp.float32).at[:N_BINS].set(w)
    b_pad = jnp.full((N_BINS_PAD, 1), -1e30, jnp.float32).at[:N_BINS, 0].set(b)
    c_pad = jnp.zeros((N, N_BINS_PAD, 1), jnp.float32).at[:, :N_BINS, 0].set(centers)

    # Optional bf16 matmul inputs (v6e/v7x): halves the dominant HBM read;
    # softmax / reduction stay in f32 (v5e VPU/EUP have no bf16 anyway).
    x_in = x_ncp.astype(compute_dtype)
    wt_pad = wt_pad.astype(compute_dtype)

    tile_p = min(tile_p, _round_up(P, 128))
    grid = (N, pl.cdiv(P, tile_p))

    cost = pl.CostEstimate(
        flops=2 * N * P * C_IN * N_BINS_PAD,
        transcendentals=N * P * N_BINS_PAD,
        bytes_accessed=int(x_in.size * x_in.dtype.itemsize + N * P * 4
                           + wt_pad.size * wt_pad.dtype.itemsize
                           + b_pad.size * 4 + c_pad.size * 4),
    )

    out = pl.pallas_call(
        _head_kernel,
        out_shape=jax.ShapeDtypeStruct((N, 1, P), jnp.float32),
        grid_spec=pltpu.PrefetchScalarGridSpec(
            num_scalar_prefetch=0,
            grid=grid,
            in_specs=[
                pl.BlockSpec((1, C_IN, tile_p), lambda n, p: (n, 0, p)),
                pl.BlockSpec((N_BINS_PAD, C_IN), lambda n, p: (0, 0)),
                pl.BlockSpec((N_BINS_PAD, 1), lambda n, p: (0, 0)),
                pl.BlockSpec((1, N_BINS_PAD, 1), lambda n, p: (n, 0, 0)),
            ],
            out_specs=pl.BlockSpec((1, 1, tile_p), lambda n, p: (n, 0, p)),
        ),
        compiler_params=pltpu.CompilerParams(
            dimension_semantics=("parallel", "parallel")),
        cost_estimate=cost,
    )(x_in, wt_pad, b_pad, c_pad)
    return out  # (N, 1, P) float32


def depthformer_v3_forward(x, range_attn_maps, bin_widths_normed, w_conv, b_conv,
                           *, min_depth, max_depth, img_size,
                           tile_p=512, compute_dtype=jnp.float32):
    """DepthformerV3.forward head (post encoder/decoder).

    Returns (pred, bin_edges, range_attn_maps) matching the PyTorch module:
      pred            (N, 1, H/2, W/2)
      bin_edges       (N, N_BINS + 1)
      range_attn_maps (N, 128, H/2, W/2)
    """
    if x.shape[-2] != img_size[0] or x.shape[-1] != img_size[1]:
        raise ValueError(
            f"Depthformer require image size should be always consistent to "
            f"{img_size}, but the input (h, w) is {tuple(x.shape[-2:])}")

    N, C, H2, W2 = range_attn_maps.shape
    P = H2 * W2

    # NOTE: the PyTorch source references an undefined `depth_output`; per the
    # AdaBins convention this is the decoder's normalized bin widths (`pred`).
    depth_output = (max_depth - min_depth) * bin_widths_normed             # (N, 100)
    bin_widths = jnp.concatenate(
        [jnp.full((N, 1), min_depth, jnp.float32), depth_output], axis=1)  # F.pad (1,0)
    bin_edges = jnp.cumsum(bin_widths, axis=1)                             # (N, 101)
    centers = 0.5 * (bin_edges[:, :-1] + bin_edges[:, 1:])                 # (N, 100)

    # NCHW-native: flattening H,W is a free reshape (no transpose pass).
    x_flat = range_attn_maps.reshape(N, C, P)
    pred_flat = conv_softmax_bincenter(x_flat, w_conv, b_conv, centers,
                                       tile_p=tile_p, compute_dtype=compute_dtype)
    pred = pred_flat.reshape(N, 1, H2, W2)
    return pred, bin_edges, range_attn_maps


def _reference(range_attn_maps, w, b, centers):
    """Plain-JAX reference of conv_out + softmax + bin-weighted sum (NCHW)."""
    logits = jnp.einsum('nchw,oc->nohw', range_attn_maps, w) + b[None, :, None, None]
    probs = jax.nn.softmax(logits, axis=1)
    return jnp.sum(probs * centers[:, :, None, None], axis=1, keepdims=True)


if __name__ == "__main__":
    key = jax.random.PRNGKey(0)
    k1, k2, k3, k4, k5 = jax.random.split(key, 5)

    N, H, W = 2, 32, 32
    H2, W2 = H // 2, W // 2
    min_depth, max_depth = 1e-3, 10.0

    # Module input (batch, 3, img_h, img_w).
    x = jax.random.normal(k1, (N, 3, H, W), jnp.float32)

    # TODO(synk): the tf_efficientnet_b5_ap backbone (torch.hub) and
    # DepthFormerDecoderV3 are external modules not defined in the provided
    # source; their outputs are stubbed deterministically here.
    range_attn_maps = jax.random.normal(k2, (N, C_IN, H2, W2), jnp.float32)
    bin_widths_normed = jax.nn.softmax(
        jax.random.normal(k3, (N, N_BINS), jnp.float32), axis=-1)

    # conv_out = Conv2d(128, 100, kernel_size=1) parameters (PyTorch (O, C) layout).
    bound = 1.0 / np.sqrt(C_IN)
    w_conv = jax.random.uniform(k4, (N_BINS, C_IN), jnp.float32, -bound, bound)
    b_conv = jax.random.uniform(k5, (N_BINS,), jnp.float32, -bound, bound)

    # --- f32 path ---------------------------------------------------------
    pred, bin_edges, ram = depthformer_v3_forward(
        x, range_attn_maps, bin_widths_normed, w_conv, b_conv,
        min_depth=min_depth, max_depth=max_depth, img_size=(H, W),
        compute_dtype=jnp.float32)
    (pred, bin_edges, ram) = jax.block_until_ready((pred, bin_edges, ram))

    # Correctness check against a plain-JAX reference.
    depth_output = (max_depth - min_depth) * bin_widths_normed
    bin_widths = jnp.concatenate(
        [jnp.full((N, 1), min_depth, jnp.float32), depth_output], axis=1)
    edges_ref = jnp.cumsum(bin_widths, axis=1)
    centers_ref = 0.5 * (edges_ref[:, :-1] + edges_ref[:, 1:])
    pred_ref = _reference(range_attn_maps, w_conv, b_conv, centers_ref)

    assert pred.shape == (N, 1, H2, W2)
    assert bin_edges.shape == (N, N_BINS + 1)
    assert ram.shape == (N, C_IN, H2, W2)
    np.testing.assert_allclose(np.asarray(pred), np.asarray(pred_ref),
                               rtol=1e-5, atol=1e-5)
    np.testing.assert_allclose(np.asarray(bin_edges), np.asarray(edges_ref),
                               rtol=1e-6, atol=1e-6)

    # --- bf16-matmul path (v6e/v7x HBM-traffic halving; f32 softmax) -------
    pred_bf16, _, _ = depthformer_v3_forward(
        x, range_attn_maps, bin_widths_normed, w_conv, b_conv,
        min_depth=min_depth, max_depth=max_depth, img_size=(H, W),
        compute_dtype=jnp.bfloat16)
    pred_bf16 = jax.block_until_ready(pred_bf16)
    np.testing.assert_allclose(np.asarray(pred_bf16), np.asarray(pred_ref),
                               rtol=5e-2, atol=5e-2)

    print("KERNEL_OK")
</pallas_src>

<mosaic_0001>
module attributes {stable_mosaic.version = 11 : i64} {
  func.func @_head_kernel(%arg0: i32, %arg1: i32, %arg2: memref<1x128x256xf32, #tpu.memory_space<vmem>>, %arg3: memref<128x128xf32, #tpu.memory_space<vmem>>, %arg4: memref<128x1xf32, #tpu.memory_space<vmem>>, %arg5: memref<1x128x1xf32, #tpu.memory_space<vmem>>, %arg6: memref<1x1x256xf32, #tpu.memory_space<vmem>>) attributes {dimension_semantics = [#tpu.dimension_semantics<parallel>, #tpu.dimension_semantics<parallel>], iteration_bounds = array<i64: 2, 1>, scalar_prefetch = 0 : i64, scratch_operands = 0 : i64, tpu.core_type = #tpu.core_type<tc>, window_params = [{transform_indices = @transform_0, window_bounds = array<i64: 1, 128, 256>}, {pipeline_mode = #tpu.pipeline_mode<synchronous>, transform_indices = @transform_1, window_bounds = array<i64: 128, 128>}, {pipeline_mode = #tpu.pipeline_mode<synchronous>, transform_indices = @transform_2, window_bounds = array<i64: 128, 1>}, {transform_indices = @transform_3, window_bounds = array<i64: 1, 128, 1>}, {transform_indices = @transform_4, window_bounds = array<i64: 1, 1, 256>}]} {
    %c0 = arith.constant 0 : index
    %c0_0 = arith.constant 0 : index
    %c0_1 = arith.constant 0 : index
    %0 = vector.load %arg2[%c0, %c0_0, %c0_1] : memref<1x128x256xf32, #tpu.memory_space<vmem>>, vector<1x128x256xf32>
    %1 = vector.shape_cast %0 : vector<1x128x256xf32> to vector<128x256xf32>
    %c0_2 = arith.constant 0 : index
    %c0_3 = arith.constant 0 : index
    %2 = vector.load %arg3[%c0_2, %c0_3] : memref<128x128xf32, #tpu.memory_space<vmem>>, vector<128x128xf32>
    %cst = arith.constant dense<0.000000e+00> : vector<128x256xf32>
    %3 = tpu.matmul %2, %1, %cst {dimension_numbers = #tpu.dot_dimension_numbers<[1], [0], [0], [1], [0, 0, 1, 1], [], []>} : vector<128x128xf32>, vector<128x256xf32>, vector<128x256xf32> -> vector<128x256xf32>
    %c0_4 = arith.constant 0 : index
    %c0_5 = arith.constant 0 : index
    %4 = vector.load %arg4[%c0_4, %c0_5] : memref<128x1xf32, #tpu.memory_space<vmem>>, vector<128x1xf32>
    %5 = vector.broadcast %4 : vector<128x1xf32> to vector<128x256xf32>
    %6 = arith.addf %3, %5 : vector<128x256xf32>
    %cst_6 = arith.constant dense<0xFF800000> : vector<256xf32>
    %7 = vector.multi_reduction <maximumf>, %6, %cst_6 [0] : vector<128x256xf32> to vector<256xf32>
    %8 = vector.shape_cast %7 : vector<256xf32> to vector<1x256xf32>
    %9 = vector.broadcast %8 : vector<1x256xf32> to vector<128x256xf32>
    %10 = arith.subf %6, %9 : vector<128x256xf32>
    %11 = math.exp %10 : vector<128x256xf32>
    %cst_7 = arith.constant dense<0.000000e+00> : vector<256xf32>
    %12 = vector.multi_reduction <add>, %11, %cst_7 [0] : vector<128x256xf32> to vector<256xf32>
    %13 = vector.shape_cast %12 : vector<256xf32> to vector<1x256xf32>
    %c0_8 = arith.constant 0 : index
    %c0_9 = arith.constant 0 : index
    %c0_10 = arith.constant 0 : index
    %14 = vector.load %arg5[%c0_8, %c0_9, %c0_10] : memref<1x128x1xf32, #tpu.memory_space<vmem>>, vector<1x128x1xf32>
    %15 = vector.shape_cast %14 : vector<1x128x1xf32> to vector<128x1xf32>
    %16 = vector.broadcast %15 : vector<128x1xf32> to vector<128x256xf32>
    %17 = arith.mulf %11, %16 : vector<128x256xf32>
    %cst_11 = arith.constant dense<0.000000e+00> : vector<256xf32>
    %18 = vector.multi_reduction <add>, %17, %cst_11 [0] : vector<128x256xf32> to vector<256xf32>
    %19 = vector.shape_cast %18 : vector<256xf32> to vector<1x256xf32>
    %20 = arith.divf %19, %13 : vector<1x256xf32>
    %21 = vector.shape_cast %20 : vector<1x256xf32> to vector<1x1x256xf32>
    %c0_12 = arith.constant 0 : index
    %c0_13 = arith.constant 0 : index
    %c0_14 = arith.constant 0 : index
    %22 = vector.load %arg6[%c0_12, %c0_13, %c0_14] : memref<1x1x256xf32, #tpu.memory_space<vmem>>, vector<1x1x256xf32>
    tpu.vector_store %arg6[%c0_12, %c0_13, %c0_14], %21 {strides = array<i32>} : memref<1x1x256xf32, #tpu.memory_space<vmem>>, vector<1x1x256xf32>,
    return
  }
  func.func @transform_0(%arg0: i32, %arg1: i32) -> (i32, i32, i32) {
    %c0_i32 = arith.constant 0 : i32
    %c0_i32_0 = arith.constant 0 : i32
    return %arg0, %c0_i32, %arg1 : i32, i32, i32
  }
  func.func @transform_1(%arg0: i32, %arg1: i32) -> (i32, i32) {
    %c0_i32 = arith.constant 0 : i32
    %c0_i32_0 = arith.constant 0 : i32
    %c0_i32_1 = arith.constant 0 : i32
    return %c0_i32, %c0_i32_0 : i32, i32
  }
  func.func @transform_2(%arg0: i32, %arg1: i32) -> (i32, i32) {
    %c0_i32 = arith.constant 0 : i32
    %c0_i32_0 = arith.constant 0 : i32
    %c0_i32_1 = arith.constant 0 : i32
    return %c0_i32, %c0_i32_0 : i32, i32
  }
  func.func @transform_3(%arg0: i32, %arg1: i32) -> (i32, i32, i32) {
    %c0_i32 = arith.constant 0 : i32
    %c0_i32_0 = arith.constant 0 : i32
    %c0_i32_1 = arith.constant 0 : i32
    return %arg0, %c0_i32, %c0_i32_0 : i32, i32, i32
  }
  func.func @transform_4(%arg0: i32, %arg1: i32) -> (i32, i32, i32) {
    %c0_i32 = arith.constant 0 : i32
    %c0_i32_0 = arith.constant 0 : i32
    return %arg0, %c0_i32, %arg1 : i32, i32, i32
  }
}

</mosaic_0001>

<bundles_post_ra>
// kernel: tpu_custom_call.1
= control target key start
LH: loop header
LB: loop body
LE: loop exit
PB: predicated region body
PF: predicated region fallthrough
CT: control target
= control target key end

     0   :  { %9 = vsyncpa [#allocation3], 0  ;;  %s1870_s0 = inlined_call_operand.hbm [shape: f32[2,128,256], index: 0, kind: input, shape index: {}]   ;;  %s1871_s1 = inlined_call_operand.vmem [shape: f32[128,128], index: 1, kind: input, shape index: {}]   ;;  %s1872_s2 = inlined_call_operand.vmem [shape: f32[128,1], index: 2, kind: input, shape index: {}]   ;;  %s1873_s3 = inlined_call_operand.vmem [shape: f32[2,128,1], index: 3, kind: input, shape index: {}]   ;;  %s1874_s4 = inlined_call_operand.hbm [shape: f32[2,1,256], index: 4, kind: output, shape index: {}]  }
   0x1   :  { %11 = vsyncpa [#allocation3 + $0x1], 0 }
   0x2   :  { %12 = vsyncpa [#allocation4], 0 }
   0x3   :  { %14 = vsyncpa [#allocation4 + $0x1], 0  ;;  %s1364_s15 = smov 0   ;;  %s1366_s16 = smov 0  }
   0x4   :  { %s1368_s17 = smov 0   ;;  %s1370_s18 = smov 0  }
   0x5   :  { %s1372_s19 = smov 0   ;;  %s1374_s20 = smov 0  }
   0x6 LB: > { %s1036_s21 = sadd.s32 4294967295, %s1334_s20   ;;  %s1037_s22 = sadd.s32 4294967294, %s1334_s20   ;;  %s1334_s20 = sphi %s1374_s20, %s20_s20   ;;  %s1330_s19 = sphi %s1372_s19, %s1883_s19   ;;  %s1326_s18 = sphi %s1370_s18, %s1882_s18   ;;  %s1322_s17 = sphi %s1368_s17, %s1881_s17   ;;  %s1318_s16 = sphi %s1366_s16, %s1880_s16   ;;  %s1314_s15 = sphi %s1364_s15, %s1879_s15  }
   0x7   : > { %s32_s23 = sadd.s32 1, %s1330_s19  ;;  %s41_s24 = sadd.s32 1, %s1322_s17 }
   0x8   : > { %p34_p0 = scmp.ge.s32.totalorder %s32_s23, 2  ;;  %p48_p1 = scmp.ne.s32.totalorder %s1322_s17, %s1318_s16 }
   0x9   : > { %p49_p2 = scmp.eq.s32.totalorder %s1334_s20, 0  ;;  %p54_p3 = scmp.ne.s32.totalorder %s1318_s16, %s1314_s15 }
   0xa   : > { %s1885_s23 = smov (%p34_p0, %s32_s23), 0  ;;  %p55_p5 = scmp.eq.s32.totalorder %s1036_s21, 0 }
   0xb   : > { %p1405_p4 = por %p49_p2, %p48_p1  ;;  %s36_s26 = ssub.s32 %s1330_s19, %s1885_s23 }
   0xc   : > { %p148_p6 = scmp.eq.s32.totalorder %s1036_s21, 1  ;;  %p39_p7 = scmp.eq.s32.totalorder %s36_s26, 0 }
   0xd   : > { %p1411_p8 = por %p55_p5, %p54_p3  ;;  %p154_p10 = scmp.eq.s32.totalorder %s1037_s22, 1 }
   0xe   : > { %p1415_p9 = por %p148_p6, %p48_p1  ;;  %p1039_p12 = scmp.ge.s32.totalorder %s1334_s20, 2 }
   0xf   : > { %s1420_s29 = scalar_select %p39_p7, %s1322_s17, %s41_s24  }
  0x10   : > { %p1422_p11 = por %p154_p10, %p54_p3  ;;  %p1098_p13 = scmp.lt.s32.totalorder %s1334_s20, 2 }
  0x11   : > { %s180_s5 = sand.u32 1, %s1322_s17   ;;  %s1052_s7 = sshll.u32 %s1330_s19, 8 }
  0x12   : > { %s1040_s6 = sshll.u32 %s180_s5, 8  ;;  %s191_s10 = scalar_lea.hbm %s1870_s0, %s1052_s7 }
  0x13   : > { %s184_s11 = scalar_lea.vmem [#allocation2], %s1040_s6  ;;  %s192_s13 = sshll.u32 %s191_s10, 4  ;;  %s193_s13 = int_to_ptr.hbm [resolvable:$true] %s192_s13 }
  0x14   : > { %s194_s12 = sshll.u32 %s184_s11, 4  ;;  %p1091_p0 = pnand %p1098_p13, %p1405_p4  ;;  %s195_s12 = int_to_ptr.vmem [resolvable:$true] %s194_s12 }
  0x15   : > { %p1043_p1 = scmp.ge.s32.totalorder %s1334_s20, 1  ;;  %s181_s14 = scalar_lea.sflag [#allocation3], %s180_s5 }
  0x16   : > { %s1336_s21 = smov 256   ;;  %s1337_s22 = smov 16  }
  0x17   : > { %1093 = dma.hbm_to_vmem [thread:$0]  (!%p1091_p0), %s193_s13, 4096, %s195_s12, %s181_s14, %s1336_s21, %s1336_s21, %s1337_s22  }
  0x18   : > { %p210_p2 = scmp.lt.s32.totalorder %s1334_s20, 3 }
  0x1a   : > { %p211_p3 = pnand %p1043_p1, %p210_p2 }
  0x1b   : > { %s1438_s24 = sand.u32 (!%p211_p3), 1, %s1318_s16  }
  0x1c   : > { %214 = sbr.rel (%p211_p3) target bundleno = 371 (0x173), region = 36  ;;  %s1044_s26 = sshll.u32 (!%p211_p3), %s1438_s24, 8 }
  0x1d   : > { %s217_s6 = scalar_lea.sflag (!%p211_p3), [#allocation3], %s1438_s24  ;;  %s1442_s7 = scalar_lea.vmem (!%p211_p3), [#allocation2], %s1044_s26 }
  0x21   : > { %1305 = dma.done.wait (%p1411_p8), %s217_s6, 4096  }
  0x22   : > { %1307 = vsyncadd (%p1411_p8), %s217_s6, 4294963200  ;;  %v1338_v0 = vmov 0   ;;  %v308_v1 = vld [vmem:[%s1872_s2 + $0x10] sm:$0xff]  ;;  %v306_v2 = vld [vmem:[%s1872_s2] sm:$0xff]  ;;  %p252_p4 = scmp.lt.s32.totalorder %s1326_s18, 1  ;;  %s1049_s22 = sshll.u32 %s1326_s18, 1 }
  0x23   : > { %1152 = vset.pattern.permute.xlu1 %v1338_v0  ;;  %1151 = vset.pattern.permute.xlu0 %v1338_v0  ;;  %v288_v3 = vld [vmem:[%s1442_s7 + $0xf0] sm:$0xff]  ;;  %v289_v4 = vld [vmem:[%s1442_s7 + $0xf8] sm:$0xff]  ;;  %v286_v5 = vld [vmem:[%s1442_s7 + $0xe0] sm:$0xff]  ;;  %vm915_vm8 = vcmask 1040384   ;;  %s924_s27 = scalar_lea.sflag [#allocation4], %s1438_s24  ;;  %s1272_s14 = scalar_lea.hbm %s1874_s4, 4 }
  0x24   : > { %1153 = vset.pattern.permute.xlu2 %v1338_v0  ;;  %334 = vperm.xlu1 %1152, %v308_v1   ;;  %v287_v6 = vld [vmem:[%s1442_s7 + $0xe8] sm:$0xff]  ;;  %v284_v7 = vld [vmem:[%s1442_s7 + $0xd0] sm:$0xff]  ;;  %v285_v8 = vld [vmem:[%s1442_s7 + $0xd8] sm:$0xff]  ;;  %s253_s11 = scalar_select %p252_p4, %s1326_s18, 1 }
  0x25   : > { %324 = vperm.xlu0 %1151, %v306_v2   ;;  %402 = vmatpush.msra.mxu0 %v288_v3  ;;  %v282_v9 = vld [vmem:[%s1442_s7 + $0xc0] sm:$0xff]  ;;  %v283_v10 = vld [vmem:[%s1442_s7 + $0xc8] sm:$0xff]  ;;  %v309_v11 = vld [vmem:[%s1872_s2 + $0x18] sm:$0xff] }
  0x26   : > { %1054 = vmatpush.msra.mxu2 %v288_v3  ;;  %467 = vmatpush.msra.mxu1 %v289_v4  ;;  %v307_v12 = vld [vmem:[%s1872_s2 + $0x8] sm:$0xff]  ;;  %v280_v13 = vld [vmem:[%s1442_s7 + $0xb0] sm:$0xff]  ;;  %v281_v14 = vld [vmem:[%s1442_s7 + $0xb8] sm:$0xff]  ;;  %s1053_s25 = sshll.u32 %s253_s11, 7 }
  0x27   : > { %1070 = vmatpush.msra.mxu3 %v289_v4  ;;  %403 = vmatpush.msra.mxu0 %v286_v5  ;;  %v278_v15 = vld [vmem:[%s1442_s7 + $0xa0] sm:$0xff]  ;;  %v279_v16 = vld [vmem:[%s1442_s7 + $0xa8] sm:$0xff]  ;;  %v276_v17 = vld [vmem:[%s1442_s7 + $0x90] sm:$0xff]  ;;  %s1527_s9 = scalar_lea.vmem %s1873_s3, %s1053_s25  ;;  %s936_s25 = scalar_lea.hbm %s1874_s4, %s1049_s22 }
  0x28   : > { %1055 = vmatpush.msra.mxu2 %v286_v5  ;;  %468 = vmatpush.msra.mxu1 %v287_v6  ;;  %v277_v18 = vld [vmem:[%s1442_s7 + $0x98] sm:$0xff]  ;;  %v274_v19 = vld [vmem:[%s1442_s7 + $0x80] sm:$0xff]  ;;  %v275_v20 = vld [vmem:[%s1442_s7 + $0x88] sm:$0xff]  ;;  %s940_s8 = sshll.u32 %s936_s25, 4  ;;  %s941_s8 = int_to_ptr.hbm [resolvable:$true] %s940_s8 }
  0x29   : > { %1071 = vmatpush.msra.mxu3 %v287_v6  ;;  %404 = vmatpush.msra.mxu0 %v284_v7  ;;  %v313_v21 = vld [vmem:[%s1872_s2 + $0x38] sm:$0xff]  ;;  %v312_v22 = vld [vmem:[%s1872_s2 + $0x30] sm:$0xff]  ;;  %v270_v25 = vld [vmem:[%s1442_s7 + $0x60] sm:$0xff]  ;;  %s1266_s10 = sshra.s32 %s941_s8, 4  ;;  %s1267_s10 = int_to_ptr.hbm [resolvable:$true] %s1266_s10 }
  0x2a   : > { %1056 = vmatpush.msra.mxu2 %v284_v7  ;;  %469 = vmatpush.msra.mxu1 %v285_v8  ;;  %v272_v23 = vld [vmem:[%s1442_s7 + $0x70] sm:$0xff]  ;;  %v273_v24 = vld [vmem:[%s1442_s7 + $0x78] sm:$0xff]  ;;  %v271_v26 = vld [vmem:[%s1442_s7 + $0x68] sm:$0xff]  ;;  %s1268_s12 = scalar_lea.hbm %s1267_s10, 2  ;;  %p1273_p8 = scmp.lt.s32.totalorder %s1267_s10, %s1874_s4 }
  0x2b   : > { %1072 = vmatpush.msra.mxu3 %v285_v8  ;;  %405 = vmatpush.msra.mxu0 %v282_v9  ;;  %v268_v27 = vld [vmem:[%s1442_s7 + $0x50] sm:$0xff]  ;;  %v269_v28 = vld [vmem:[%s1442_s7 + $0x58] sm:$0xff]  ;;  %v266_v29 = vld [vmem:[%s1442_s7 + $0x40] sm:$0xff]  ;;  %p1269_p5 = scmp.ne.s32.totalorder %s1267_s10, %s1268_s12  ;;  %p1274_p10 = scmp.lt.s32.totalorder %s1272_s14, %s1268_s12 }
  0x2c   : > { %1057 = vmatpush.msra.mxu2 %v282_v9  ;;  %470 = vmatpush.msra.mxu1 %v283_v10  ;;  %v267_v30 = vld [vmem:[%s1442_s7 + $0x48] sm:$0xff]  ;;  %v316_v31 = vld [vmem:[%s1872_s2 + $0x50] sm:$0xff]  ;;  %v265_v34 = vld [vmem:[%s1442_s7 + $0x38] sm:$0xff] }
  0x2d   : > { %1073 = vmatpush.msra.mxu3 %v283_v10  ;;  %339 = vperm.xlu1 %1152, %v309_v11   ;;  %v315_v32 = vld [vmem:[%s1872_s2 + $0x48] sm:$0xff]  ;;  %v264_v33 = vld [vmem:[%s1442_s7 + $0x30] sm:$0xff]  ;;  %v310_v35 = vld [vmem:[%s1872_s2 + $0x20] sm:$0xff]  ;;  %p1270_p6 = pnand %p1269_p5, %p1415_p9  ;;  %p1275_p13 = por %p1274_p10, %p1273_p8 }
  0x2e   : > { %329 = vperm.xlu0 %1151, %v307_v12   ;;  %406 = vmatpush.msra.mxu0 %v280_v13  ;;  %v262_v36 = vld [vmem:[%s1442_s7 + $0x20] sm:$0xff]  ;;  %v263_v37 = vld [vmem:[%s1442_s7 + $0x28] sm:$0xff]  ;;  %v260_v38 = vld [vmem:[%s1442_s7 + $0x10] sm:$0xff] }
  0x2f   : > { %1058 = vmatpush.msra.mxu2 %v280_v13  ;;  %471 = vmatpush.msra.mxu1 %v281_v14  ;;  %v261_v39 = vld [vmem:[%s1442_s7 + $0x18] sm:$0xff]  ;;  %v258_v40 = vld [vmem:[%s1442_s7] sm:$0xff]  ;;  %v259_v41 = vld [vmem:[%s1442_s7 + $0x8] sm:$0xff]  ;;  %p1271_p7 = pneg %p1270_p6 }
  0x30   : > { %1074 = vmatpush.msra.mxu3 %v281_v14  ;;  %407 = vmatpush.msra.mxu0 %v278_v15  ;;  %v290_v42 = vld [vmem:[%s1871_s1] sm:$0xff]  ;;  %v319_v44 = vld [vmem:[%s1872_s2 + $0x68] sm:$0xff]  ;;  %v321_v50 = vld [vmem:[%s1872_s2 + $0x78] sm:$0xff] }
  0x31   : > { %1059 = vmatpush.msra.mxu2 %v278_v15  ;;  %472 = vmatpush.msra.mxu1 %v279_v16  ;;  %v298_v43 = vld [vmem:[%s1871_s1 + $0x40] sm:$0xff]  ;;  %v311_v46 = vld [vmem:[%s1872_s2 + $0x28] sm:$0xff]  ;;  %v292_v52 = vld [vmem:[%s1871_s1 + $0x10] sm:$0xff]  ;;  %p1276_p0 = pnand %p1275_p13, %p1271_p7 }
  0x32   : > { %1075 = vmatpush.msra.mxu3 %v279_v16  ;;  %408 = vmatpush.msra.mxu0 %v276_v17  ;;  %v318_v45 = vld [vmem:[%s1872_s2 + $0x60] sm:$0xff]  ;;  %v291_v47 = vld [vmem:[%s1871_s1 + $0x8] sm:$0xff]  ;;  %v300_v53 = vld [vmem:[%s1871_s1 + $0x50] sm:$0xff] }
  0x33   : > { %1060 = vmatpush.msra.mxu2 %v276_v17  ;;  %473 = vmatpush.msra.mxu1 %v277_v18  ;;  %v299_v48 = vld [vmem:[%s1871_s1 + $0x48] sm:$0xff]  ;;  %v712_v49 = vld [vmem:[%s1527_s9] sm:$0xff]  ;;  %v715_v54 = vld [vmem:[%s1527_s9 + $0x18] sm:$0xff] }
  0x34   : > { %1076 = vmatpush.msra.mxu3 %v277_v18  ;;  %409 = vmatpush.msra.mxu0 %v274_v19  ;;  %v314_v51 = vld [vmem:[%s1872_s2 + $0x40] sm:$0xff]  ;;  %v714_v55 = vld [vmem:[%s1527_s9 + $0x10] sm:$0xff]  ;;  %v317_v56 = vld [vmem:[%s1872_s2 + $0x58] sm:$0xff] }
  0x35   : > { %1061 = vmatpush.msra.mxu2 %v274_v19  ;;  %474 = vmatpush.msra.mxu1 %v275_v20  ;;  %v293_v57 = vld [vmem:[%s1871_s1 + $0x18] sm:$0xff]  ;;  %v718_v59 = vld [vmem:[%s1527_s9 + $0x30] sm:$0xff]  ;;  %v717_v60 = vld [vmem:[%s1527_s9 + $0x28] sm:$0xff] }
  0x36   : > { %1077 = vmatpush.msra.mxu3 %v275_v20  ;;  %359 = vperm.xlu1 %1152, %v313_v21   ;;  %v301_v58 = vld [vmem:[%s1871_s1 + $0x58] sm:$0xff]  ;;  %v320_v61 = vld [vmem:[%s1872_s2 + $0x70] sm:$0xff]  ;;  %v294_v62 = vld [vmem:[%s1871_s1 + $0x20] sm:$0xff] }
  0x37   : > { %354 = vperm.xlu0 %1151, %v312_v22   ;;  %410 = vmatpush.msra.mxu0 %v272_v23  ;;  %v302_v63 = vld [vmem:[%s1871_s1 + $0x60] sm:$0xff]  ;;  %v721_v0 = vld [vmem:[%s1527_s9 + $0x48] sm:$0xff]  ;;  %v723_v6 = vld [vmem:[%s1527_s9 + $0x58] sm:$0xff] }
  0x38   : > { %1062 = vmatpush.msra.mxu2 %v272_v23  ;;  %475 = vmatpush.msra.mxu1 %v273_v24  ;;  %v720_v1 = vld [vmem:[%s1527_s9 + $0x40] sm:$0xff]  ;;  %v713_v2 = vld [vmem:[%s1527_s9 + $0x8] sm:$0xff]  ;;  %v296_v8 = vld [vmem:[%s1871_s1 + $0x30] sm:$0xff] }
  0x39   : > { %1078 = vmatpush.msra.mxu3 %v273_v24  ;;  %411 = vmatpush.msra.mxu0 %v270_v25  ;;  %v295_v3 = vld [vmem:[%s1871_s1 + $0x28] sm:$0xff]  ;;  %v724_v5 = vld [vmem:[%s1527_s9 + $0x60] sm:$0xff]  ;;  %v304_v9 = vld [vmem:[%s1871_s1 + $0x70] sm:$0xff] }
  0x3a   : > { %1063 = vmatpush.msra.mxu2 %v270_v25  ;;  %476 = vmatpush.msra.mxu1 %v271_v26  ;;  %v303_v4 = vld [vmem:[%s1871_s1 + $0x68] sm:$0xff]  ;;  %v716_v7 = vld [vmem:[%s1527_s9 + $0x20] sm:$0xff]  ;;  %v727_v10 = vld [vmem:[%s1527_s9 + $0x78] sm:$0xff] }
  0x3b   : > { %1079 = vmatpush.msra.mxu3 %v271_v26  ;;  %412 = vmatpush.msra.mxu0 %v268_v27  ;;  %v726_v11 = vld [vmem:[%s1527_s9 + $0x70] sm:$0xff]  ;;  %v719_v12 = vld [vmem:[%s1527_s9 + $0x38] sm:$0xff]  ;;  %v725_v16 = vld [vmem:[%s1527_s9 + $0x68] sm:$0xff] }
  0x3c   : > { %1064 = vmatpush.msra.mxu2 %v268_v27  ;;  %477 = vmatpush.msra.mxu1 %v269_v28  ;;  %v297_v13 = vld [vmem:[%s1871_s1 + $0x38] sm:$0xff]  ;;  %v722_v15 = vld [vmem:[%s1527_s9 + $0x50] sm:$0xff]  ;;  %s1045_s9 = sshll.u32 %s1438_s24, 1 }
  0x3d   : > { %1080 = vmatpush.msra.mxu3 %v269_v28  ;;  %413 = vmatpush.msra.mxu0 %v266_v29  ;;  %v305_v14 = vld [vmem:[%s1871_s1 + $0x78] sm:$0xff]  ;;  %s250_s18 = scalar_lea.vmem [#allocation5], %s1045_s9 }
  0x3e   : > { %1065 = vmatpush.msra.mxu2 %v266_v29  ;;  %478 = vmatpush.msra.mxu1 %v267_v30  ;;  %s938_s5 = sshll.u32 %s250_s18, 4  ;;  %s939_s5 = int_to_ptr.vmem [resolvable:$true] %s938_s5 }
  0x3f   : > { %1081 = vmatpush.msra.mxu3 %v267_v30  ;;  %374 = vperm.xlu1 %1152, %v316_v31  }
  0x40   : > { %369 = vperm.xlu0 %1151, %v315_v32   ;;  %414 = vmatpush.msra.mxu0 %v264_v33 }
  0x41   : > { %1066 = vmatpush.msra.mxu2 %v264_v33  ;;  %479 = vmatpush.msra.mxu1 %v265_v34 }
  0x42   : > { %1082 = vmatpush.msra.mxu3 %v265_v34  ;;  %344 = vperm.xlu2 %1153, %v310_v35  }
  0x43   : > { %415 = vmatpush.msra.mxu0 %v262_v36  ;;  %1067 = vmatpush.msra.mxu2 %v262_v36 }
  0x44   : > { %480 = vmatpush.msra.mxu1 %v263_v37  ;;  %1083 = vmatpush.msra.mxu3 %v263_v37 }
  0x45   : > { %416 = vmatpush.msra.mxu0 %v260_v38  ;;  %1068 = vmatpush.msra.mxu2 %v260_v38 }
  0x46   : > { %481 = vmatpush.msra.mxu1 %v261_v39  ;;  %1084 = vmatpush.msra.mxu3 %v261_v39 }
  0x47   : > { %417 = vmatpush.msra.mxu0 %v258_v40  ;;  %1069 = vmatpush.msra.mxu2 %v258_v40 }
  0x48   : > { %482 = vmatpush.msra.mxu1 %v259_v41  ;;  %1085 = vmatpush.msra.mxu3 %v259_v41 }
  0x49   : > { %418 = vmatmul.f32.vlgmr.msra.gmra.mxu0 %v290_v42  ;;  %442 = vmatmul.f32.vlgmr.msra.gmra.mxu2 %v298_v43 }
  0x4a   : > { %483 = vmatmul.f32.vlgmr.msra.gmra.mxu1 %v290_v42  ;;  %507 = vmatmul.f32.vlgmr.msra.gmra.mxu3 %v298_v43 }
  0x4b   : > { %389 = vperm.xlu1 %1152, %v319_v44   ;;  %384 = vperm.xlu0 %1151, %v318_v45  }
  0x4c   : > { %349 = vperm.xlu2 %1153, %v311_v46  }
  0x51   : > { %421 = vmatmul.f32.gmra.mxu0 %v291_v47  ;;  %445 = vmatmul.f32.gmra.mxu2 %v299_v48 }
  0x52   : > { %486 = vmatmul.f32.gmra.mxu1 %v291_v47  ;;  %510 = vmatmul.f32.gmra.mxu3 %v299_v48 }
  0x53   : > { %730 = vperm.xlu1 %1152, %v712_v49   ;;  %399 = vperm.xlu0 %1151, %v321_v50  }
  0x54   : > { %364 = vperm.xlu2 %1153, %v314_v51  }
  0x59   : > { %424 = vmatmul.f32.gmra.mxu0 %v292_v52  ;;  %448 = vmatmul.f32.gmra.mxu2 %v300_v53 }
  0x5a   : > { %489 = vmatmul.f32.gmra.mxu1 %v292_v52  ;;  %513 = vmatmul.f32.gmra.mxu3 %v300_v53 }
  0x5b   : > { %745 = vperm.xlu1 %1152, %v715_v54   ;;  %740 = vperm.xlu0 %1151, %v714_v55  }
  0x5c   : > { %379 = vperm.xlu2 %1153, %v317_v56  }
  0x61   : > { %427 = vmatmul.f32.gmra.mxu0 %v293_v57  ;;  %451 = vmatmul.f32.gmra.mxu2 %v301_v58 }
  0x62   : > { %492 = vmatmul.f32.gmra.mxu1 %v293_v57  ;;  %516 = vmatmul.f32.gmra.mxu3 %v301_v58 }
  0x63   : > { %760 = vperm.xlu1 %1152, %v718_v59   ;;  %755 = vperm.xlu0 %1151, %v717_v60  }
  0x64   : > { %394 = vperm.xlu2 %1153, %v320_v61  }
  0x69   : > { %430 = vmatmul.f32.gmra.mxu0 %v294_v62  ;;  %454 = vmatmul.f32.gmra.mxu2 %v302_v63 }
  0x6a   : > { %495 = vmatmul.f32.gmra.mxu1 %v294_v62  ;;  %519 = vmatmul.f32.gmra.mxu3 %v302_v63 }
  0x6b   : > { %775 = vperm.xlu1 %1152, %v721_v0   ;;  %770 = vperm.xlu0 %1151, %v720_v1  }
  0x6c   : > { %735 = vperm.xlu2 %1153, %v713_v2  }
  0x71   : > { %433 = vmatmul.f32.gmra.mxu0 %v295_v3  ;;  %457 = vmatmul.f32.gmra.mxu2 %v303_v4 }
  0x72   : > { %498 = vmatmul.f32.gmra.mxu1 %v295_v3  ;;  %522 = vmatmul.f32.gmra.mxu3 %v303_v4 }
  0x73   : > { %790 = vperm.xlu1 %1152, %v724_v5   ;;  %785 = vperm.xlu0 %1151, %v723_v6  }
  0x74   : > { %750 = vperm.xlu2 %1153, %v716_v7  }
  0x79   : > { %436 = vmatmul.f32.gmra.mxu0 %v296_v8  ;;  %460 = vmatmul.f32.gmra.mxu2 %v304_v9 }
  0x7a   : > { %501 = vmatmul.f32.gmra.mxu1 %v296_v8  ;;  %525 = vmatmul.f32.gmra.mxu3 %v304_v9 }
  0x7b   : > { %805 = vperm.xlu1 %1152, %v727_v10   ;;  %800 = vperm.xlu0 %1151, %v726_v11  }
  0x7c   : > { %765 = vperm.xlu2 %1153, %v719_v12  }
  0x81   : > { %439 = vmatmul.f32.gmra.mxu0 %v297_v13  ;;  %463 = vmatmul.f32.gmra.mxu2 %v305_v14 }
  0x82   : > { %504 = vmatmul.f32.gmra.mxu1 %v297_v13  ;;  %528 = vmatmul.f32.gmra.mxu3 %v305_v14 }
  0x84   : > { %780 = vperm.xlu2 %1153, %v722_v15  }
  0x8c   : > { %795 = vperm.xlu2 %1153, %v725_v16  }
  0x96   : > { %v335_v28 = vpop.permute.xlu1 %334 }
  0x97   : > { %v325_v23 = vpop.permute.xlu0 %324 }
  0x9c   : > { %v345_v30 = vpop.permute.xlu2 %344 }
  0x9f   : > { %v340_v37 = vpop.permute.xlu1 %339 }
  0xa0   : > { %v330_v32 = vpop.permute.xlu0 %329 }
  0xa6   : > { %v350_v39 = vpop.permute.xlu2 %349 }
  0xa8   : > { %v360_v46 = vpop.permute.xlu1 %359 }
  0xa9   : > { %v355_v41 = vpop.permute.xlu0 %354 }
  0xae   : > { %v365_v47 = vpop.permute.xlu2 %364 }
  0xb1   : > { %v375_v3 = vpop.permute.xlu1 %374 }
  0xb2   : > { %v370_v49 = vpop.permute.xlu0 %369 }
  0xb6   : > { %v380_v6 = vpop.permute.xlu2 %379 }
  0xbd   : > { %v385_v10 = vpop.permute.xlu0 %384 }
  0xc6   : > { %v419_v17 = vpop.f32.mrf.mxu0 }
  0xc7   : > { %v484_v18 = vpop.f32.mrf.mxu1  ;;  %v1611_v51 = vadd.f32 %v419_v17, %v325_v23 }
  0xc8   : > { %v1615_v53 = vadd.f32 %v484_v18, %v325_v23 }
  0xcc   : > { %v443_v19 = vpop.f32.mrf.mxu2 }
  0xcd   : > { %v508_v20 = vpop.f32.mrf.mxu3  ;;  %v1635_v7 = vadd.f32 %v443_v19, %v365_v47 }
  0xce   : > { %v422_v21 = vpop.f32.mrf.mxu0  ;;  %v1641_v11 = vadd.f32 %v508_v20, %v365_v47 }
  0xcf   : > { %v487_v22 = vpop.f32.mrf.mxu1  ;;  %v1637_v8 = vadd.f32 %v422_v21, %v330_v32 }
  0xd0   : > { %v1643_v12 = vadd.f32 %v487_v22, %v330_v32 }
  0xd4   : > { %v1599_v24 = vpop.f32.mrf.mxu2 }
  0xd5   : > { %v1601_v25 = vpop.f32.mrf.mxu3  ;;  %v1664_v32 = vadd.f32 %v1599_v24, %v370_v49  ;;  %v390_v24 = vpop.permute.xlu1 %389 }
  0xd6   : > { %v425_v26 = vpop.f32.mrf.mxu0 }
  0xd7   : > { %v490_v27 = vpop.f32.mrf.mxu1  ;;  %v1607_v48 = vadd.f32 %v425_v26, %v335_v28 }
  0xd8   : > { %v1609_v50 = vadd.f32 %v490_v27, %v335_v28 }
  0xd9   : > { %v532_v56 = vmax.f32 %v1611_v51, %v1607_v48 }
  0xda   : > { %v553_v58 = vmax.f32 %v1615_v53, %v1609_v50 }
  0xdc   : > { %v449_v29 = vpop.f32.mrf.mxu2 }
  0xdd   : > { %v514_v31 = vpop.f32.mrf.mxu3  ;;  %v1653_v23 = vadd.f32 %v449_v29, %v375_v3  ;;  %v1669_v29 = vadd.f32 %v1601_v25, %v370_v49 }
  0xde   : > { %v428_v33 = vpop.f32.mrf.mxu0  ;;  %v1658_v27 = vadd.f32 %v514_v31, %v375_v3 }
  0xdf   : > { %v493_v34 = vpop.f32.mrf.mxu1  ;;  %v1629_v1 = vadd.f32 %v428_v33, %v340_v37 }
  0xe0   : > { %v1632_v4 = vadd.f32 %v493_v34, %v340_v37 }
  0xe1   : > { %v533_v15 = vmax.f32 %v1637_v8, %v1629_v1 }
  0xe2   : > { %v554_v18 = vmax.f32 %v1643_v12, %v1632_v4 }
  0xe4   : > { %v1603_v35 = vpop.f32.mrf.mxu2 }
  0xe5   : > { %v1605_v36 = vpop.f32.mrf.mxu3  ;;  %v1674_v31 = vadd.f32 %v1603_v35, %v380_v6 }
  0xe6   : > { %v431_v38 = vpop.f32.mrf.mxu0 }
  0xe7   : > { %v496_v40 = vpop.f32.mrf.mxu1  ;;  %v1613_v52 = vadd.f32 %v431_v38, %v345_v30 }
  0xe8   : > { %v1617_v54 = vadd.f32 %v496_v40, %v345_v30 }
  0xe9   : > { %v534_v60 = vmax.f32 %v532_v56, %v1613_v52  ;;  %v400_v56 = vpop.permute.xlu0 %399 }
  0xea   : > { %v555_v63 = vmax.f32 %v553_v58, %v1617_v54 }
  0xec   : > { %v455_v42 = vpop.f32.mrf.mxu2 }
  0xed   : > { %v520_v43 = vpop.f32.mrf.mxu3 }
  0xee   : > { %v434_v44 = vpop.f32.mrf.mxu0 }
  0xef   : > { %v499_v45 = vpop.f32.mrf.mxu1  ;;  %v1639_v9 = vadd.f32 %v434_v44, %v350_v39  ;;  %v1682_v44 = vadd.f32 %v520_v43, %v385_v10 }
  0xf0   : > { %v1645_v13 = vadd.f32 %v499_v45, %v350_v39  ;;  %v1676_v39 = vadd.f32 %v455_v42, %v385_v10  ;;  %v395_v42 = vpop.permute.xlu2 %394 }
  0xf1   : > { %v535_v20 = vmax.f32 %v533_v15, %v1639_v9 }
  0xf2   : > { %v556_v28 = vmax.f32 %v554_v18, %v1645_v13 }
  0xf4   : > { %v458_v55 = vpop.f32.mrf.mxu2 }
  0xf5   : > { %v523_v57 = vpop.f32.mrf.mxu3 }
  0xf6   : > { %v437_v59 = vpop.f32.mrf.mxu0  ;;  %v1689_v58 = vadd.f32 %v523_v57, %v390_v24 }
  0xf7   : > { %v1624_v61 = vadd.f32 %v437_v59, %v355_v41  ;;  %v502_v62 = vpop.f32.mrf.mxu1 }
  0xf8   : > { %v1627_v0 = vadd.f32 %v502_v62, %v355_v41  ;;  %v1680_v41 = vadd.f32 %v1605_v36, %v380_v6 }
  0xf9   : > { %v536_v2 = vmax.f32 %v534_v60, %v1624_v61 }
  0xfa   : > { %v557_v5 = vmax.f32 %v555_v63, %v1627_v0 }
  0xfb   : > { %v538_v16 = vmax.f32 %v536_v2, %v1635_v7 }
  0xfc   : > { %v461_v14 = vpop.f32.mrf.mxu2  ;;  %v559_v19 = vmax.f32 %v557_v5, %v1641_v11 }
  0xfd   : > { %v526_v17 = vpop.f32.mrf.mxu3  ;;  %v540_v33 = vmax.f32 %v538_v16, %v1653_v23  ;;  %v1693_v43 = vadd.f32 %v461_v14, %v395_v42 }
  0xfe   : > { %v440_v21 = vpop.f32.mrf.mxu0  ;;  %v561_v37 = vmax.f32 %v559_v19, %v1658_v27  ;;  %v1698_v62 = vadd.f32 %v526_v17, %v395_v42  ;;  %v1725_v42 = vpop.permute.xlu2 %735 }
  0xff   : > { %v1656_v22 = vadd.f32 %v440_v21, %v360_v46  ;;  %v505_v26 = vpop.f32.mrf.mxu1  ;;  %v542_v47 = vmax.f32 %v540_v33, %v1676_v39 }
 0x100   : > { %v1661_v30 = vadd.f32 %v505_v26, %v360_v46  ;;  %v1685_v46 = vadd.f32 %v458_v55, %v390_v24  ;;  %v563_v59 = vmax.f32 %v561_v37, %v1682_v44 }
 0x101   : > { %v537_v34 = vmax.f32 %v535_v20, %v1656_v22  ;;  %v544_v3 = vmax.f32 %v542_v47, %v1693_v43 }
 0x102   : > { %v558_v38 = vmax.f32 %v556_v28, %v1661_v30  ;;  %v565_v5 = vmax.f32 %v563_v59, %v1698_v62 }
 0x103   : > { %v539_v40 = vmax.f32 %v537_v34, %v1664_v32 }
 0x104   : > { %v560_v25 = vmax.f32 %v558_v38, %v1669_v29  ;;  %v464_v45 = vpop.f32.mrf.mxu2 }
 0x105   : > { %v541_v35 = vmax.f32 %v539_v40, %v1674_v31  ;;  %v529_v49 = vpop.f32.mrf.mxu3  ;;  %v1695_v60 = vadd.f32 %v464_v45, %v400_v56 }
 0x106   : > { %v562_v36 = vmax.f32 %v560_v25, %v1680_v41  ;;  %v1700_v63 = vadd.f32 %v529_v49, %v400_v56  ;;  %v1719_v49 = vpop.permute.xlu1 %730 }
 0x107   : > { %v543_v55 = vmax.f32 %v541_v35, %v1685_v46 }
 0x108   : > { %v564_v2 = vmax.f32 %v562_v36, %v1689_v58 }
 0x109   : > { %v545_v57 = vmax.f32 %v543_v55, %v1695_v60  ;;  %v1733_v55 = vpop.permute.xlu0 %740 }
 0x10a   : > { %v566_v6 = vmax.f32 %v564_v2, %v1700_v63 }
 0x10b   : > { %v546_v10 = vmax.f32 %v544_v3, %v545_v57 }
 0x10c   : > { %v567_v14 = vmax.f32 %v565_v5, %v566_v6 }
 0x10d   : > { %v547_v15 = vrot.slane %v546_v10, 4 }
 0x10e   : > { %v568_v18 = vrot.slane %v567_v14, 4 }
 0x10f   : > { %v548_v16 = vmax.f32 %v546_v10, %v547_v15 }
 0x110   : > { %v569_v21 = vmax.f32 %v567_v14, %v568_v18 }
 0x111   : > { %v549_v19 = vrot.slane %v548_v16, 2 }
 0x112   : > { %v570_v28 = vrot.slane %v569_v21, 2 }
 0x113   : > { %v550_v17 = vmax.f32 %v548_v16, %v549_v19  ;;  %v1753_v19 = vpop.permute.xlu1 %745 }
 0x114   : > { %v571_v40 = vmax.f32 %v569_v21, %v570_v28 }
 0x115   : > { %v551_v20 = vrot.slane %v550_v17, 1 }
 0x117   : > { %v1707_v26 = vmax.f32 %v550_v17, %v551_v20 }
 0x119   : > { %v574_v33 = vsub.f32 %v1611_v51, %v1707_v26  ;;  %v576_v34 = vsub.f32 %v1637_v8, %v1707_v26  ;;  %v578_v37 = vsub.f32 %v1607_v48, %v1707_v26  ;;  %v580_v38 = vsub.f32 %v1629_v1, %v1707_v26 }
 0x11a   : > { %v582_v24 = vsub.f32 %v1613_v52, %v1707_v26  ;;  %v584_v51 = vsub.f32 %v1639_v9, %v1707_v26  ;;  %v572_v8 = vrot.slane %v571_v40, 1  ;;  %v586_v1 = vsub.f32 %v1624_v61, %v1707_v26 }
 0x11b   : > { %v606_v25 = vmul.f32 1.442695, %v574_v33  ;;  %v610_v45 = vmul.f32 1.442695, %v576_v34  ;;  %v614_v47 = vmul.f32 1.442695, %v578_v37  ;;  %v588_v52 = vsub.f32 %v1656_v22, %v1707_v26 }
 0x11c   : > { %v618_v35 = vmul.f32 1.442695, %v580_v38  ;;  %v622_v48 = vmul.f32 1.442695, %v582_v24  ;;  %v626_v56 = vmul.f32 1.442695, %v584_v51  ;;  %v1729_v59 = vmax.f32 %v571_v40, %v572_v8  ;;  %v1761_v38 = vpop.permute.xlu2 %750 }
 0x11d   : > { %1154 = vpow2.f32 %v606_v25  ;;  %v590_v9 = vsub.f32 %v1635_v7, %v1707_v26  ;;  %v592_v61 = vsub.f32 %v1664_v32, %v1707_v26  ;;  %v594_v2 = vsub.f32 %v1653_v23, %v1707_v26 }
 0x11e   : > { %1156 = vpow2.f32 %v610_v45  ;;  %v630_v3 = vmul.f32 1.442695, %v586_v1  ;;  %v596_v22 = vsub.f32 %v1674_v31, %v1707_v26  ;;  %v598_v5 = vsub.f32 %v1676_v39, %v1707_v26 }
 0x11f   : > { %1158 = vpow2.f32 %v614_v47  ;;  %v634_v6 = vmul.f32 1.442695, %v588_v52  ;;  %v575_v32 = vsub.f32 %v1615_v53, %v1729_v59  ;;  %v600_v16 = vsub.f32 %v1685_v46, %v1707_v26  ;;  %v1770_v52 = vpop.permute.xlu0 %755 }
 0x120   : > { %1160 = vpow2.f32 %v618_v35  ;;  %v638_v18 = vmul.f32 1.442695, %v590_v9  ;;  %v577_v31 = vsub.f32 %v1643_v12, %v1729_v59  ;;  %v579_v39 = vsub.f32 %v1609_v50, %v1729_v59 }
 0x121   : > { %1162 = vpow2.f32 %v622_v48  ;;  %v602_v53 = vsub.f32 %v1693_v43, %v1707_v26  ;;  %v642_v46 = vmul.f32 1.442695, %v592_v61  ;;  %v581_v33 = vsub.f32 %v1632_v4, %v1729_v59 }
 0x122   : > { %1164 = vpow2.f32 %v626_v56  ;;  %v608_v37 = vmul.f32 1.442695, %v575_v32  ;;  %v604_v40 = vsub.f32 %v1695_v60, %v1707_v26  ;;  %v583_v24 = vsub.f32 %v1617_v54, %v1729_v59 }
 0x123   : > { %v1155_v36 = vpop.eup %1154  ;;  %1166 = vpow2.f32 %v630_v3  ;;  %v612_v43 = vmul.f32 1.442695, %v577_v31  ;;  %v616_v35 = vmul.f32 1.442695, %v579_v39  ;;  %v646_v51 = vmul.f32 1.442695, %v594_v2 }
 0x124   : > { %v1157_v57 = vpop.eup %1156  ;;  %v808_v7 = vmul.f32 %v1155_v36, %v1719_v49  ;;  %1168 = vpow2.f32 %v634_v6  ;;  %v650_v8 = vmul.f32 1.442695, %v596_v22  ;;  %v585_v48 = vsub.f32 %v1645_v13, %v1729_v59 }
 0x125   : > { %v1159_v10 = vpop.eup %1158  ;;  %v670_v14 = vadd.f32 %v1157_v57, %v1155_v36  ;;  %v810_v15 = vmul.f32 %v1157_v57, %v1725_v42  ;;  %1170 = vpow2.f32 %v638_v18  ;;  %v620_v54 = vmul.f32 1.442695, %v581_v33 }
 0x126   : > { %v1161_v23 = vpop.eup %1160  ;;  %v812_v21 = vmul.f32 %v1159_v10, %v1733_v55  ;;  %1172 = vpow2.f32 %v642_v46  ;;  %v654_v9 = vmul.f32 1.442695, %v598_v5  ;;  %v658_v36 = vmul.f32 1.442695, %v600_v16 }
 0x127   : > { %v671_v17 = vadd.f32 %v1159_v10, %v670_v14  ;;  %v840_v20 = vadd.f32 %v810_v15, %v808_v7  ;;  %v1163_v28 = vpop.eup %1162  ;;  %v814_v34 = vmul.f32 %v1161_v23, %v1753_v19  ;;  %1174 = vpow2.f32 %v608_v37  ;;  %v1775_v10 = vpop.permute.xlu1 %760 }
 0x128   : > { %v1165_v25 = vpop.eup %1164  ;;  %v816_v47 = vmul.f32 %v1163_v28, %v1761_v38  ;;  %1176 = vpow2.f32 %v612_v43  ;;  %v587_v2 = vsub.f32 %v1627_v0, %v1729_v59  ;;  %v624_v57 = vmul.f32 1.442695, %v583_v24 }
 0x129   : > { %v672_v12 = vadd.f32 %v1161_v23, %v671_v17  ;;  %v841_v50 = vadd.f32 %v840_v20, %v812_v21  ;;  %v1167_v1 = vpop.eup %1166  ;;  %v818_v61 = vmul.f32 %v1165_v25, %v1770_v52  ;;  %1178 = vpow2.f32 %v616_v35 }
 0x12a   : > { %v1169_v56 = vpop.eup %1168  ;;  %1180 = vpow2.f32 %v646_v51  ;;  %v662_v22 = vmul.f32 1.442695, %v602_v53  ;;  %v666_v6 = vmul.f32 1.442695, %v604_v40  ;;  %v589_v5 = vsub.f32 %v1661_v30, %v1729_v59 }
 0x12b   : > { %v673_v45 = vadd.f32 %v1163_v28, %v672_v12  ;;  %v842_v4 = vadd.f32 %v841_v50, %v814_v34  ;;  %v1171_v13 = vpop.eup %1170  ;;  %1182 = vpow2.f32 %v620_v54  ;;  %v628_v15 = vmul.f32 1.442695, %v585_v48 }
 0x12c   : > { %v1779_v32 = vpop.eup %1172  ;;  %1184 = vpow2.f32 %v650_v8  ;;  %v820_v0 = vmul.f32 %v1167_v1, %v1775_v10  ;;  %v591_v23 = vsub.f32 %v1641_v11, %v1729_v59  ;;  %v593_v16 = vsub.f32 %v1669_v29, %v1729_v59  ;;  %v1791_v11 = vpop.permute.xlu2 %765 }
 0x12d   : > { %v674_v60 = vadd.f32 %v1165_v25, %v673_v45  ;;  %v843_v26 = vadd.f32 %v842_v4, %v816_v47  ;;  %v1175_v18 = vpop.eup %1174  ;;  %v595_v39 = vsub.f32 %v1658_v27, %v1729_v59  ;;  %1186 = vpow2.f32 %v624_v57  ;;  %v771_v4 = vpop.permute.xlu0 %770 }
 0x12e   : > { %v632_v30 = vmul.f32 1.442695, %v587_v2  ;;  %v1177_v17 = vpop.eup %1176  ;;  %1188 = vpow2.f32 %v654_v9  ;;  %v597_v20 = vsub.f32 %v1680_v41, %v1729_v59  ;;  %v809_v28 = vmul.f32 %v1175_v18, %v1719_v49 }
 0x12f   : > { %v675_v3 = vadd.f32 %v1167_v1, %v674_v60  ;;  %v844_v7 = vadd.f32 %v843_v26, %v818_v61  ;;  %v1179_v53 = vpop.eup %1178  ;;  %1190 = vpow2.f32 %v628_v15  ;;  %v636_v46 = vmul.f32 1.442695, %v589_v5  ;;  %v776_v57 = vpop.permute.xlu1 %775 }
 0x130   : > { %v691_v33 = vadd.f32 %v1177_v17, %v1175_v18  ;;  %v1181_v12 = vpop.eup %1180  ;;  %1192 = vpow2.f32 %v658_v36  ;;  %v822_v27 = vmul.f32 %v1169_v56, %v1791_v11  ;;  %v599_v34 = vsub.f32 %v1682_v44, %v1729_v59 }
 0x131   : > { %v676_v14 = vadd.f32 %v1169_v56, %v675_v3  ;;  %v845_v21 = vadd.f32 %v844_v7, %v820_v0  ;;  %v811_v50 = vmul.f32 %v1177_v17, %v1725_v42  ;;  %v1183_v41 = vpop.eup %1182  ;;  %1194 = vpow2.f32 %v632_v30 }
 0x132   : > { %v640_v49 = vmul.f32 1.442695, %v591_v23  ;;  %v692_v40 = vadd.f32 %v1179_v53, %v691_v33  ;;  %v1798_v24 = vpop.eup %1184  ;;  %1196 = vpow2.f32 %v662_v22  ;;  %v813_v25 = vmul.f32 %v1179_v53, %v1733_v55 }
 0x133   : > { %v677_v31 = vadd.f32 %v1171_v13, %v676_v14  ;;  %v846_v43 = vadd.f32 %v845_v21, %v822_v27  ;;  %v861_v45 = vadd.f32 %v811_v50, %v809_v28  ;;  %v1187_v47 = vpop.eup %1186  ;;  %1198 = vpow2.f32 %v636_v46 }
 0x134   : > { %v644_v44 = vmul.f32 1.442695, %v593_v16  ;;  %v693_v51 = vadd.f32 %v1183_v41, %v692_v40  ;;  %v1802_v42 = vpop.eup %1188  ;;  %1200 = vpow2.f32 %v666_v6  ;;  %v824_v8 = vmul.f32 %v1171_v13, %v771_v4 }
 0x135   : > { %v678_v29 = vadd.f32 %v1779_v32, %v677_v31  ;;  %v815_v48 = vmul.f32 %v1183_v41, %v1753_v19  ;;  %v862_v1 = vadd.f32 %v861_v45, %v813_v25  ;;  %v1191_v60 = vpop.eup %1190  ;;  %1202 = vpow2.f32 %v640_v49 }
 0x136   : > { %v648_v55 = vmul.f32 1.442695, %v595_v39  ;;  %v694_v54 = vadd.f32 %v1187_v47, %v693_v51  ;;  %v1806_v56 = vpop.eup %1192  ;;  %v847_v9 = vadd.f32 %v846_v43, %v824_v8  ;;  %v601_v36 = vsub.f32 %v1689_v58, %v1729_v59 }
 0x137   : > { %v679_v37 = vadd.f32 %v1181_v12, %v678_v29  ;;  %v817_v61 = vmul.f32 %v1187_v47, %v1761_v38  ;;  %v863_v3 = vadd.f32 %v862_v1, %v815_v48  ;;  %v1195_v2 = vpop.eup %1194  ;;  %1204 = vpow2.f32 %v644_v44 }
 0x138   : > { %v652_v13 = vmul.f32 1.442695, %v597_v20  ;;  %v695_v22 = vadd.f32 %v1191_v60, %v694_v54  ;;  %v1812_v6 = vpop.eup %1196  ;;  %v826_v7 = vmul.f32 %v1779_v32, %v776_v57  ;;  %v603_v14 = vsub.f32 %v1698_v62, %v1729_v59  ;;  %v781_v32 = vpop.permute.xlu2 %780 }
 0x139   : > { %v680_v35 = vadd.f32 %v1798_v24, %v679_v37  ;;  %v819_v5 = vmul.f32 %v1191_v60, %v1770_v52  ;;  %v864_v58 = vadd.f32 %v863_v3, %v817_v61  ;;  %v1199_v15 = vpop.eup %1198  ;;  %1206 = vpow2.f32 %v648_v55  ;;  %v786_v37 = vpop.permute.xlu0 %785 }
 0x13a   : > { %v656_v0 = vmul.f32 1.442695, %v599_v34  ;;  %v696_v23 = vadd.f32 %v1195_v2, %v695_v22  ;;  %v1819_v16 = vpop.eup %1200  ;;  %v848_v18 = vadd.f32 %v847_v9, %v826_v7  ;;  %v821_v31 = vmul.f32 %v1195_v2, %v1775_v10 }
 0x13b   : > { %v681_v26 = vadd.f32 %v1802_v42, %v680_v35  ;;  %v865_v39 = vadd.f32 %v864_v58, %v819_v5  ;;  %v1203_v30 = vpop.eup %1202  ;;  %1208 = vpow2.f32 %v652_v13  ;;  %v660_v62 = vmul.f32 1.442695, %v601_v36 }
 0x13c   : > { %v697_v52 = vadd.f32 %v1199_v15, %v696_v23  ;;  %v828_v21 = vmul.f32 %v1181_v12, %v781_v32  ;;  %v605_v20 = vsub.f32 %v1700_v63, %v1729_v59  ;;  %v823_v28 = vmul.f32 %v1199_v15, %v1791_v11 }
 0x13d   : > { %v682_v19 = vadd.f32 %v1806_v56, %v681_v26  ;;  %v866_v53 = vadd.f32 %v865_v39, %v821_v31  ;;  %v1205_v29 = vpop.eup %1204  ;;  %1210 = vpow2.f32 %v656_v0  ;;  %v664_v33 = vmul.f32 1.442695, %v603_v14 }
 0x13e   : > { %v698_v10 = vadd.f32 %v1203_v30, %v697_v52  ;;  %v849_v27 = vadd.f32 %v848_v18, %v828_v21  ;;  %v825_v34 = vmul.f32 %v1203_v30, %v771_v4  ;;  %1212 = vpow2.f32 %v660_v62  ;;  %v791_v4 = vpop.permute.xlu1 %790 }
 0x13f   : > { %v683_v38 = vadd.f32 %v1812_v6, %v682_v19  ;;  %v867_v50 = vadd.f32 %v866_v53, %v823_v28  ;;  %v1207_v41 = vpop.eup %1206  ;;  %v830_v12 = vmul.f32 %v1798_v24, %v786_v37  ;;  %v668_v43 = vmul.f32 1.442695, %v605_v20 }
 0x140   : > { %v699_v40 = vadd.f32 %v1205_v29, %v698_v10  ;;  %v827_v63 = vmul.f32 %v1205_v29, %v776_v57  ;;  %1214 = vpow2.f32 %v664_v33  ;;  %v829_v35 = vmul.f32 %v1207_v41, %v781_v32  ;;  %v796_v2 = vpop.permute.xlu2 %795 }
 0x141   : > { %v684_v17 = vadd.f32 %v1819_v16, %v683_v38  ;;  %v868_v59 = vadd.f32 %v867_v50, %v825_v34  ;;  %v1209_v11 = vpop.eup %1208  ;;  %v850_v47 = vadd.f32 %v849_v27, %v830_v12  ;;  %v832_v1 = vmul.f32 %v1802_v42, %v791_v4  ;;  %v801_v7 = vpop.permute.xlu0 %800 }
 0x142   : > { %v700_v45 = vadd.f32 %v1207_v41, %v699_v40  ;;  %1216 = vpow2.f32 %v668_v43  ;;  %v831_v60 = vmul.f32 %v1209_v11, %v786_v37  ;;  %v834_v19 = vmul.f32 %v1806_v56, %v796_v2 }
 0x143   : > { %v685_v46 = vrot.slane %v684_v17, 4  ;;  %v869_v44 = vadd.f32 %v868_v59, %v827_v63  ;;  %v1211_v51 = vpop.eup %1210  ;;  %v851_v9 = vadd.f32 %v850_v47, %v832_v1  ;;  %v836_v23 = vmul.f32 %v1812_v6, %v801_v7 }
 0x144   : > { %v701_v48 = vadd.f32 %v1209_v11, %v700_v45  ;;  %v1213_v24 = vpop.eup %1212  ;;  %v833_v36 = vmul.f32 %v1211_v51, %v791_v4 }
 0x145   : > { %v686_v49 = vadd.f32 %v685_v46, %v684_v17  ;;  %v870_v26 = vadd.f32 %v869_v44, %v829_v35  ;;  %v835_v13 = vmul.f32 %v1213_v24, %v796_v2  ;;  %v852_v58 = vadd.f32 %v851_v9, %v834_v19 }
 0x146   : > { %v702_v54 = vadd.f32 %v1211_v51, %v701_v48  ;;  %v1215_v3 = vpop.eup %1214  ;;  %v806_v31 = vpop.permute.xlu1 %805 }
 0x147   : > { %v687_v25 = vrot.slane %v686_v49, 2  ;;  %v871_v61 = vadd.f32 %v870_v26, %v831_v60  ;;  %v837_v15 = vmul.f32 %v1215_v3, %v801_v7  ;;  %v853_v30 = vadd.f32 %v852_v58, %v836_v23 }
 0x148   : > { %v703_v57 = vadd.f32 %v1213_v24, %v702_v54  ;;  %v1217_v42 = vpop.eup %1216  ;;  %v838_v56 = vmul.f32 %v1819_v16, %v806_v31  ;;  %v918_v26 = vlaneseq }
 0x149   : > { %v688_v8 = vadd.f32 %v687_v25, %v686_v49  ;;  %v872_v22 = vadd.f32 %v871_v61, %v833_v36  ;;  %v839_v32 = vmul.f32 %v1217_v42, %v806_v31 }
 0x14a   : > { %v704_v5 = vadd.f32 %v1215_v3, %v703_v57  ;;  %v854_v21 = vadd.f32 %v853_v30, %v838_v56  ;;  %vm920_vm9 = vcmp.lt.s32.totalorder %v918_v26, 256 }
 0x14b   : > { %v689_v55 = vrot.slane %v688_v8, 1  ;;  %v873_v38 = vadd.f32 %v872_v22, %v835_v13 }
 0x14c   : > { %v705_v0 = vadd.f32 %v1217_v42, %v704_v5  ;;  %v855_v46 = vrot.slane %v854_v21, 4 }
 0x14d   : > { %v690_v14 = vadd.f32 %v689_v55, %v688_v8  ;;  %v874_v18 = vadd.f32 %v873_v38, %v837_v15 }
 0x14e   : > { %v706_v39 = vrot.slane %v705_v0, 4  ;;  %v856_v27 = vadd.f32 %v855_v46, %v854_v21 }
 0x14f   : > { %1218 = vrcp.f32 %v690_v14  ;;  %v875_v62 = vadd.f32 %v874_v18, %v839_v32  ;;  %vm887_vm1 = vweird.f32 %v690_v14  ;;  %v891_v59 = vand.u32 2147483647, %v690_v14 }
 0x150   : > { %v707_v17 = vadd.f32 %v706_v39, %v705_v0  ;;  %v857_v41 = vrot.slane %v856_v27, 2  ;;  %v893_v11 = vand.u32 2147483648, %v690_v14 }
 0x151   : > { %v876_v53 = vrot.slane %v875_v62, 4  ;;  %vm892_vm5 = vcmp.eq.f32.partialorder %v891_v59, 8.507059e+37 }
 0x152   : > { %v708_v52 = vrot.slane %v707_v17, 2  ;;  %v858_v12 = vadd.f32 %v857_v41, %v856_v27  ;;  %v894_v8 = vor.u32 1.1754944e-38, %v893_v11 }
 0x153   : > { %v877_v6 = vadd.f32 %v876_v53, %v875_v62 }
 0x154   : > { %v709_v28 = vadd.f32 %v708_v52, %v707_v17  ;;  %v859_v44 = vrot.slane %v858_v12, 1 }
 0x155   : > { %v1219_v20 = vpop.eup %1218  ;;  %v878_v50 = vrot.slane %v877_v6, 2 }
 0x156   : > { %v710_v29 = vrot.slane %v709_v28, 1  ;;  %v883_v33 = vmul.f32 %v1219_v20, %v690_v14  ;;  %vm888_vm0 = vweird.f32 %v1219_v20  ;;  %v860_v54 = vadd.f32 %v859_v44, %v858_v12 }
 0x157   : > { %v879_v16 = vadd.f32 %v878_v50, %v877_v6  ;;  %vm889_vm3 = vmor %vm887_vm1, %vm888_vm0 }
 0x158   : > { %v711_v10 = vadd.f32 %v710_v29, %v709_v28  ;;  %v884_v34 = vsub.f32 1.0, %v883_v33 }
 0x159   : > { %v880_v45 = vrot.slane %v879_v16, 1 }
 0x15a   : > { %1220 = vrcp.f32 %v711_v10  ;;  %v885_v37 = vmul.f32 %v1219_v20, %v884_v34  ;;  %v908_v25 = vand.u32 2147483648, %v711_v10  ;;  %v906_v35 = vand.u32 2147483647, %v711_v10 }
 0x15b   : > { %vm902_vm4 = vweird.f32 %v711_v10  ;;  %v881_v1 = vadd.f32 %v880_v45, %v879_v16 }
 0x15c   : > { %v886_v43 = vadd.f32 %v1219_v20, %v885_v37  ;;  %v909_v48 = vor.u32 1.1754944e-38, %v908_v25  ;;  %vm907_vm7 = vcmp.eq.f32.partialorder %v906_v35, 8.507059e+37 }
 0x15e   : > { %v890_v51 = vsel %vm889_vm3, %v1219_v20, %v886_v43 }
 0x15f   : > { %v895_v24 = vsel %vm892_vm5, %v894_v8, %v890_v51 }
 0x160   : > { %v1221_v49 = vpop.eup %1220  ;;  %v896_v36 = vmul.f32 %v895_v24, %v860_v54 }
 0x161   : > { %v898_v40 = vmul.f32 %v1221_v49, %v711_v10  ;;  %vm903_vm2 = vweird.f32 %v1221_v49 }
 0x162   : > { %vm904_vm6 = vmor %vm902_vm4, %vm903_vm2 }
 0x163   : > { %v899_v63 = vsub.f32 1.0, %v898_v40 }
 0x165   : > { %v900_v47 = vmul.f32 %v1221_v49, %v899_v63 }
 0x167   : > { %v901_v4 = vadd.f32 %v1221_v49, %v900_v47 }
 0x169   : > { %v905_v60 = vsel %vm904_vm6, %v1221_v49, %v901_v4 }
 0x16a   : > { %v910_v55 = vsel %vm907_vm7, %v909_v48, %v905_v60 }
 0x16b   : > { %v911_v9 = vmul.f32 %v910_v55, %v881_v1 }
 0x16d   : > { %v914_v61 = vrot.slane %v911_v9, 7 }
 0x16f   : > { %v916_v3 = vsel %vm915_vm8, %v896_v36, %v914_v61 }
 0x170   : > { %922 = vst.msk [vmem:[%s250_s18] sm:$0x3] %vm920_vm9, %v916_v3 }
 0x171   : > { %1279 = shalt.err (!%p1276_p0)
}
 0x172   : > { %1088 = dma.vmem_to_hbm [thread:$0]  (%p1415_p9), %s939_s5, 32, %s941_s8, %s924_s27  }
 0x173 PF: > { %s952_s24 = sand.u32 1, %s1314_s15   ;;  %p1095_p1 = pnand %p1039_p12, %p1422_p11 }
 0x174   : > { %s953_s9 = scalar_lea.sflag [#allocation4], %s952_s24 }
 0x175   : > { %p1096_p2 = pneg %p1095_p1 }
 0x177   : > { %1309 = dma.done.wait (%p1096_p2), %s953_s9, 32  }
 0x178   : > { %1311 = vsyncadd (%p1096_p2), %s953_s9, 4294967264  ;;  %s20_s20 = sadd.s32 1, %s1334_s20   ;;  %s1879_s15 = smov %s1318_s16 }
 0x179   : > { %p17_p3 = scmp.ge.s32.totalorder %s20_s20, 4   ;;  %s1880_s16 = smov %s1322_s17 }
 0x17a   : > { %s1881_s17 = smov %s1420_s29  ;;  %s1882_s18 = smov %s1330_s19 }
 0x17b   : > { %s1883_s19 = smov %s1885_s23  ;;  %19 = sbr.rel (!%p17_p3) target bundleno = 6 (0x6), region = 84 }
 0x180   :  { %959 = vsyncpa [#allocation3], 1 }
 0x181   :  { %961 = vsyncpa [#allocation3 + $0x1], 1 }
 0x182   :  { %962 = vsyncpa [#allocation4], 1 }
 0x183   :  { %964 = vsyncpa [#allocation4 + $0x1], 1 }

</bundles_post_ra>
